<compile_context>
chip_gen: v7x
topology: tpu7x:2x2x1
jax: 0.10.0
libtpu: 0.0.40
codegen_flags: <defaults>
</compile_context>

<pallas_src>
import math

import jax
import jax.numpy as jnp
from jax.experimental import pallas as pl
from jax.experimental.pallas import tpu as pltpu

MIN_LOG_STD = -20.0
MAX_LOG_STD = 2.0
MIN_ACTION = -3.0
MAX_ACTION = 3.0
LOG_2PI = math.log(2.0 * math.pi)


def actor_kernel(state_ref, noise_ref,
                 w1_ref, b1_ref, w2_ref, b2_ref, w3_ref, b3_ref, w4_ref, b4_ref,
                 std_ref, neg_inv_two_var_ref, logp_sum_ref,
                 action_ref, logp_ref):
    # state arrives in its native (TB, S) layout; transpose in-kernel (XLU) so the
    # batch sits on the 128-wide lane axis for every subsequent op.
    x_t = state_ref[...].T                                                # (S, TB)

    # MLP: Linear -> ReLU -> Linear -> ReLU -> Linear -> ReLU -> Linear
    h = jnp.maximum(
        jnp.dot(w1_ref[...], x_t, preferred_element_type=jnp.float32) + b1_ref[...], 0.0)
    h = jnp.maximum(
        jnp.dot(w2_ref[...], h, preferred_element_type=jnp.float32) + b2_ref[...], 0.0)
    h = jnp.maximum(
        jnp.dot(w3_ref[...], h, preferred_element_type=jnp.float32) + b3_ref[...], 0.0)
    mean = jnp.dot(w4_ref[...], h, preferred_element_type=jnp.float32) + b4_ref[...]  # (A, TB)

    # rsample: mean + std * eps, then in-place clamp (log_prob uses the clamped action)
    action = jnp.clip(mean + std_ref[...] * noise_ref[...], MIN_ACTION, MAX_ACTION)

    # Normal(mean, std).log_prob(action).sum over action dim, with the constant term
    # (-sum_A(log_std) - 0.5*A*log(2pi)) pre-reduced to a scalar in the wrapper.
    diff = action - mean
    quad = jnp.sum(diff * diff * neg_inv_two_var_ref[...], axis=0, keepdims=True)  # (1, TB)

    action_ref[...] = action.astype(action_ref.dtype)
    logp_ref[...] = quad + logp_sum_ref[...]                              # (1, TB)


def _round_up(x, m):
    return ((x + m - 1) // m) * m


def _cdiv(a, b):
    return -(-a // b)


def actor_forward(state, noise_t, params, *, max_batch_tile=8192):
    """state: (B, S); noise_t: (A, B) std-normal eps (transposed layout, iid so
    equivalent to the (B, A) rsample noise); params in PyTorch layout (out, in)."""
    B, S = state.shape
    H = params["w1"].shape[0]
    A = params["w4"].shape[0]
    assert noise_t.shape == (A, B)

    # --- batch tiling: big lane-dense tiles, >= 2 grid steps for B >= 256 so the
    # "parallel" grid axis can use both TensorCores on v7x. Padding < 128*n_tiles.
    max_batch_tile = max(_round_up(max_batch_tile, 128), 128)
    if B < 256:
        n_tiles = 1
        TB = max(_round_up(B, 128), 128)
    else:
        n_tiles = max(2, _cdiv(B, max_batch_tile))
        TB = _round_up(_cdiv(B, n_tiles), 128)
    B_pad = TB * n_tiles
    pad = B_pad - B

    f32 = jnp.float32
    state_p = state.astype(f32)                                           # (B, S) native layout
    noise_p = noise_t.astype(f32)                                         # (A, B)
    if pad:
        state_p = jnp.pad(state_p, ((0, pad), (0, 0)))                    # (B_pad, S)
        noise_p = jnp.pad(noise_p, ((0, 0), (0, pad)))                    # (A, B_pad)

    def col(x):  # (out,) -> (out, 1) column vector for lane broadcast
        return jnp.reshape(x.astype(f32), (-1, 1))

    # Hoist the log_std pipeline out of the kernel: functions of parameters only.
    log_std_c = jnp.clip(col(params["log_std"]), MIN_LOG_STD, MAX_LOG_STD)  # (A, 1)
    std = jnp.exp(log_std_c)
    neg_inv_two_var = -0.5 / (std * std)
    # Fully reduced constant term of sum_A log_prob: a single scalar.
    logp_const_sum = jnp.reshape(-(jnp.sum(log_std_c) + 0.5 * A * LOG_2PI), (1, 1))

    w1, w2, w3, w4 = (params[k].astype(f32) for k in ("w1", "w2", "w3", "w4"))
    b1, b2, b3, b4 = (col(params[k]) for k in ("b1", "b2", "b3", "b4"))

    def const_spec(shape):
        # Constant index_map -> stays VMEM-resident across grid steps.
        # (pipeline_mode=pl.Buffered(1) would halve residency once H is large.)
        return pl.BlockSpec(shape, lambda i: (0, 0))

    # Explicit scoped-VMEM budget: resident weights/consts (default double-buffered)
    # + double-buffered streaming tiles, with margin; matters on v5e (16 MiB default)
    # once hidden_dim grows. Clamped well below v7x's 64 MiB physical VMEM.
    stream_bytes = 2 * 4 * TB * (S + 2 * A + 1)
    resident_bytes = 2 * 4 * (S * H + 2 * H * H + H * A + 3 * H + 4 * A + 1)
    vmem_limit = int(min(60 << 20, max(16 << 20,
                                       stream_bytes + resident_bytes + (2 << 20))))

    flops = 2 * B_pad * (S * H + 2 * H * H + H * A) + 8 * B_pad * A
    bytes_accessed = 4 * (B_pad * (S + 2 * A + 1)
                          + (S * H + 2 * H * H + H * A) + 3 * H + 4 * A + 1)

    action_t, logp_t = pl.pallas_call(
        actor_kernel,
        out_shape=(jax.ShapeDtypeStruct((A, B_pad), f32),
                   jax.ShapeDtypeStruct((1, B_pad), f32)),
        grid=(n_tiles,),
        in_specs=[
            pl.BlockSpec((TB, S), lambda i: (i, 0)),   # state, native layout, streamed
            pl.BlockSpec((A, TB), lambda i: (0, i)),   # noise, lane-dense, streamed
            const_spec((H, S)), const_spec((H, 1)),    # w1, b1  (VMEM-resident)
            const_spec((H, H)), const_spec((H, 1)),    # w2, b2
            const_spec((H, H)), const_spec((H, 1)),    # w3, b3
            const_spec((A, H)), const_spec((A, 1)),    # w4, b4
            const_spec((A, 1)),                        # std
            const_spec((A, 1)),                        # -1/(2 std^2)
            const_spec((1, 1)),                        # -(sum log_std + 0.5*A*log(2pi))
        ],
        out_specs=(pl.BlockSpec((A, TB), lambda i: (0, i)),
                   pl.BlockSpec((1, TB), lambda i: (0, i))),
        compiler_params=pltpu.CompilerParams(
            dimension_semantics=("parallel",),
            vmem_limit_bytes=vmem_limit),
        cost_estimate=pl.CostEstimate(flops=flops, transcendentals=0,
                                      bytes_accessed=bytes_accessed),
    )(state_p, noise_p, w1, b1, w2, b2, w3, b3, w4, b4,
      std, neg_inv_two_var, logp_const_sum)

    # Return in PyTorch (B, A)/(B, 1) layout; a consumer happy with (A, B)/(1, B)
    # could take action_t/logp_t directly and skip these small output copies.
    action = action_t[:, :B].T                # (B, A)
    log_prob = logp_t[:, :B].T                # (B, 1)
    return action, log_prob


def actor_forward_ref(state, noise, params):
    """Pure-JAX reference (PyTorch-layout weights) for correctness checking.
    noise: (B, A) standard normal (the rsample eps)."""
    h = jnp.maximum(state @ params["w1"].T + params["b1"], 0.0)
    h = jnp.maximum(h @ params["w2"].T + params["b2"], 0.0)
    h = jnp.maximum(h @ params["w3"].T + params["b3"], 0.0)
    mean = h @ params["w4"].T + params["b4"]
    log_std = jnp.clip(params["log_std"], MIN_LOG_STD, MAX_LOG_STD)
    std = jnp.exp(log_std)
    action = jnp.clip(mean + std * noise, MIN_ACTION, MAX_ACTION)
    diff = action - mean
    elem = -(diff * diff) / (2.0 * std * std) - log_std - 0.5 * LOG_2PI
    return action, jnp.sum(elem, axis=-1, keepdims=True)


if __name__ == "__main__":
    state_dim, action_dim, hidden_dim = 16, 8, 32
    batch = 8

    key = jax.random.PRNGKey(0)
    keys = jax.random.split(key, 10)

    def init_linear(kw, kb, fan_in, fan_out):
        # Matches PyTorch nn.Linear default: U(-1/sqrt(fan_in), 1/sqrt(fan_in)).
        bound = 1.0 / math.sqrt(fan_in)
        w = jax.random.uniform(kw, (fan_out, fan_in), jnp.float32, -bound, bound)
        b = jax.random.uniform(kb, (fan_out,), jnp.float32, -bound, bound)
        return w, b

    w1, b1 = init_linear(keys[0], keys[1], state_dim, hidden_dim)
    w2, b2 = init_linear(keys[2], keys[3], hidden_dim, hidden_dim)
    w3, b3 = init_linear(keys[4], keys[5], hidden_dim, hidden_dim)
    w4, b4 = init_linear(keys[6], keys[7], hidden_dim, action_dim)
    log_std = jnp.zeros((action_dim,), jnp.float32)     # nn.Parameter(torch.zeros(A))

    params = dict(w1=w1, b1=b1, w2=w2, b2=b2, w3=w3, b3=b3, w4=w4, b4=b4,
                  log_std=log_std)

    state = jax.random.normal(keys[8], (batch, state_dim), jnp.float32)
    # rsample eps generated directly in the kernel's (A, B) layout (iid -> equivalent).
    noise_t = jax.random.normal(keys[9], (action_dim, batch), jnp.float32)

    action, log_prob = actor_forward(state, noise_t, params)
    jax.block_until_ready((action, log_prob))

    ref_action, ref_logp = actor_forward_ref(state, noise_t.T, params)
    assert action.shape == (batch, action_dim) and log_prob.shape == (batch, 1)
    assert jnp.allclose(action, ref_action, atol=1e-5, rtol=1e-5)
    assert jnp.allclose(log_prob, ref_logp, atol=1e-4, rtol=1e-5)

    print("KERNEL_OK")
</pallas_src>

<mosaic_0001>
module attributes {stable_mosaic.version = 11 : i64} {
  func.func @actor_kernel(%arg0: i32, %arg1: memref<128x16xf32, #tpu.memory_space<vmem>>, %arg2: memref<8x128xf32, #tpu.memory_space<vmem>>, %arg3: memref<32x16xf32, #tpu.memory_space<vmem>>, %arg4: memref<32x1xf32, #tpu.memory_space<vmem>>, %arg5: memref<32x32xf32, #tpu.memory_space<vmem>>, %arg6: memref<32x1xf32, #tpu.memory_space<vmem>>, %arg7: memref<32x32xf32, #tpu.memory_space<vmem>>, %arg8: memref<32x1xf32, #tpu.memory_space<vmem>>, %arg9: memref<8x32xf32, #tpu.memory_space<vmem>>, %arg10: memref<8x1xf32, #tpu.memory_space<vmem>>, %arg11: memref<8x1xf32, #tpu.memory_space<vmem>>, %arg12: memref<8x1xf32, #tpu.memory_space<vmem>>, %arg13: memref<1x1xf32, #tpu.memory_space<vmem>>, %arg14: memref<8x128xf32, #tpu.memory_space<vmem>>, %arg15: memref<1x128xf32, #tpu.memory_space<vmem>>) attributes {dimension_semantics = [#tpu.dimension_semantics<parallel>], iteration_bounds = array<i64: 1>, scalar_prefetch = 0 : i64, scratch_operands = 0 : i64, tpu.core_type = #tpu.core_type<tc>, window_params = [{transform_indices = @transform_0, window_bounds = array<i64: 128, 16>}, {transform_indices = @transform_1, window_bounds = array<i64: 8, 128>}, {pipeline_mode = #tpu.pipeline_mode<synchronous>, transform_indices = @transform_2, window_bounds = array<i64: 32, 16>}, {pipeline_mode = #tpu.pipeline_mode<synchronous>, transform_indices = @transform_3, window_bounds = array<i64: 32, 1>}, {pipeline_mode = #tpu.pipeline_mode<synchronous>, transform_indices = @transform_4, window_bounds = array<i64: 32, 32>}, {pipeline_mode = #tpu.pipeline_mode<synchronous>, transform_indices = @transform_5, window_bounds = array<i64: 32, 1>}, {pipeline_mode = #tpu.pipeline_mode<synchronous>, transform_indices = @transform_6, window_bounds = array<i64: 32, 32>}, {pipeline_mode = #tpu.pipeline_mode<synchronous>, transform_indices = @transform_7, window_bounds = array<i64: 32, 1>}, {pipeline_mode = #tpu.pipeline_mode<synchronous>, transform_indices = @transform_8, window_bounds = array<i64: 8, 32>}, {pipeline_mode = #tpu.pipeline_mode<synchronous>, transform_indices = @transform_9, window_bounds = array<i64: 8, 1>}, {pipeline_mode = #tpu.pipeline_mode<synchronous>, transform_indices = @transform_10, window_bounds = array<i64: 8, 1>}, {pipeline_mode = #tpu.pipeline_mode<synchronous>, transform_indices = @transform_11, window_bounds = array<i64: 8, 1>}, {pipeline_mode = #tpu.pipeline_mode<synchronous>, transform_indices = @transform_12, window_bounds = array<i64: 1, 1>}, {transform_indices = @transform_13, window_bounds = array<i64: 8, 128>}, {transform_indices = @transform_14, window_bounds = array<i64: 1, 128>}]} {
    %c0 = arith.constant 0 : index
    %c0_0 = arith.constant 0 : index
    %0 = vector.load %arg1[%c0, %c0_0] : memref<128x16xf32, #tpu.memory_space<vmem>>, vector<128x16xf32>
    %1 = tpu.transpose %0, [1, 0] : vector<128x16xf32> -> vector<16x128xf32>
    %c0_1 = arith.constant 0 : index
    %c0_2 = arith.constant 0 : index
    %2 = vector.load %arg3[%c0_1, %c0_2] : memref<32x16xf32, #tpu.memory_space<vmem>>, vector<32x16xf32>
    %cst = arith.constant dense<0.000000e+00> : vector<32x128xf32>
    %3 = tpu.matmul %2, %1, %cst {dimension_numbers = #tpu.dot_dimension_numbers<[1], [0], [0], [1], [0, 0, 1, 1], [], []>} : vector<32x16xf32>, vector<16x128xf32>, vector<32x128xf32> -> vector<32x128xf32>
    %c0_3 = arith.constant 0 : index
    %c0_4 = arith.constant 0 : index
    %4 = vector.load %arg4[%c0_3, %c0_4] : memref<32x1xf32, #tpu.memory_space<vmem>>, vector<32x1xf32>
    %5 = vector.broadcast %4 : vector<32x1xf32> to vector<32x128xf32>
    %6 = arith.addf %3, %5 : vector<32x128xf32>
    %cst_5 = arith.constant 0.000000e+00 : f32
    %7 = vector.broadcast %cst_5 : f32 to vector<32x128xf32>
    %8 = arith.maximumf %6, %7 : vector<32x128xf32>
    %c0_6 = arith.constant 0 : index
    %c0_7 = arith.constant 0 : index
    %9 = vector.load %arg5[%c0_6, %c0_7] : memref<32x32xf32, #tpu.memory_space<vmem>>, vector<32x32xf32>
    %cst_8 = arith.constant dense<0.000000e+00> : vector<32x128xf32>
    %10 = tpu.matmul %9, %8, %cst_8 {dimension_numbers = #tpu.dot_dimension_numbers<[1], [0], [0], [1], [0, 0, 1, 1], [], []>} : vector<32x32xf32>, vector<32x128xf32>, vector<32x128xf32> -> vector<32x128xf32>
    %c0_9 = arith.constant 0 : index
    %c0_10 = arith.constant 0 : index
    %11 = vector.load %arg6[%c0_9, %c0_10] : memref<32x1xf32, #tpu.memory_space<vmem>>, vector<32x1xf32>
    %12 = vector.broadcast %11 : vector<32x1xf32> to vector<32x128xf32>
    %13 = arith.addf %10, %12 : vector<32x128xf32>
    %cst_11 = arith.constant 0.000000e+00 : f32
    %14 = vector.broadcast %cst_11 : f32 to vector<32x128xf32>
    %15 = arith.maximumf %13, %14 : vector<32x128xf32>
    %c0_12 = arith.constant 0 : index
    %c0_13 = arith.constant 0 : index
    %16 = vector.load %arg7[%c0_12, %c0_13] : memref<32x32xf32, #tpu.memory_space<vmem>>, vector<32x32xf32>
    %cst_14 = arith.constant dense<0.000000e+00> : vector<32x128xf32>
    %17 = tpu.matmul %16, %15, %cst_14 {dimension_numbers = #tpu.dot_dimension_numbers<[1], [0], [0], [1], [0, 0, 1, 1], [], []>} : vector<32x32xf32>, vector<32x128xf32>, vector<32x128xf32> -> vector<32x128xf32>
    %c0_15 = arith.constant 0 : index
    %c0_16 = arith.constant 0 : index
    %18 = vector.load %arg8[%c0_15, %c0_16] : memref<32x1xf32, #tpu.memory_space<vmem>>, vector<32x1xf32>
    %19 = vector.broadcast %18 : vector<32x1xf32> to vector<32x128xf32>
    %20 = arith.addf %17, %19 : vector<32x128xf32>
    %cst_17 = arith.constant 0.000000e+00 : f32
    %21 = vector.broadcast %cst_17 : f32 to vector<32x128xf32>
    %22 = arith.maximumf %20, %21 : vector<32x128xf32>
    %c0_18 = arith.constant 0 : index
    %c0_19 = arith.constant 0 : index
    %23 = vector.load %arg9[%c0_18, %c0_19] : memref<8x32xf32, #tpu.memory_space<vmem>>, vector<8x32xf32>
    %cst_20 = arith.constant dense<0.000000e+00> : vector<8x128xf32>
    %24 = tpu.matmul %23, %22, %cst_20 {dimension_numbers = #tpu.dot_dimension_numbers<[1], [0], [0], [1], [0, 0, 1, 1], [], []>} : vector<8x32xf32>, vector<32x128xf32>, vector<8x128xf32> -> vector<8x128xf32>
    %c0_21 = arith.constant 0 : index
    %c0_22 = arith.constant 0 : index
    %25 = vector.load %arg10[%c0_21, %c0_22] : memref<8x1xf32, #tpu.memory_space<vmem>>, vector<8x1xf32>
    %26 = vector.broadcast %25 : vector<8x1xf32> to vector<8x128xf32>
    %27 = arith.addf %24, %26 : vector<8x128xf32>
    %c0_23 = arith.constant 0 : index
    %c0_24 = arith.constant 0 : index
    %28 = vector.load %arg11[%c0_23, %c0_24] : memref<8x1xf32, #tpu.memory_space<vmem>>, vector<8x1xf32>
    %c0_25 = arith.constant 0 : index
    %c0_26 = arith.constant 0 : index
    %29 = vector.load %arg2[%c0_25, %c0_26] : memref<8x128xf32, #tpu.memory_space<vmem>>, vector<8x128xf32>
    %30 = vector.broadcast %28 : vector<8x1xf32> to vector<8x128xf32>
    %31 = arith.mulf %30, %29 : vector<8x128xf32>
    %32 = arith.addf %27, %31 : vector<8x128xf32>
    %cst_27 = arith.constant -3.000000e+00 : f32
    %cst_28 = arith.constant 3.000000e+00 : f32
    %33 = vector.broadcast %cst_27 : f32 to vector<8x128xf32>
    %34 = arith.maximumf %33, %32 : vector<8x128xf32>
    %35 = vector.broadcast %cst_28 : f32 to vector<8x128xf32>
    %36 = arith.minimumf %35, %34 : vector<8x128xf32>
    %37 = arith.subf %36, %27 : vector<8x128xf32>
    %38 = arith.mulf %37, %37 : vector<8x128xf32>
    %c0_29 = arith.constant 0 : index
    %c0_30 = arith.constant 0 : index
    %39 = vector.load %arg12[%c0_29, %c0_30] : memref<8x1xf32, #tpu.memory_space<vmem>>, vector<8x1xf32>
    %40 = vector.broadcast %39 : vector<8x1xf32> to vector<8x128xf32>
    %41 = arith.mulf %38, %40 : vector<8x128xf32>
    %cst_31 = arith.constant dense<0.000000e+00> : vector<128xf32>
    %42 = vector.multi_reduction <add>, %41, %cst_31 [0] : vector<8x128xf32> to vector<128xf32>
    %43 = vector.shape_cast %42 : vector<128xf32> to vector<1x128xf32>
    %c0_32 = arith.constant 0 : index
    %c0_33 = arith.constant 0 : index
    %44 = vector.load %arg14[%c0_32, %c0_33] : memref<8x128xf32, #tpu.memory_space<vmem>>, vector<8x128xf32>
    tpu.vector_store %arg14[%c0_32, %c0_33], %36 {strides = array<i32>} : memref<8x128xf32, #tpu.memory_space<vmem>>, vector<8x128xf32>,
    %c0_34 = arith.constant 0 : index
    %c0_35 = arith.constant 0 : index
    %45 = vector.load %arg13[%c0_34, %c0_35] : memref<1x1xf32, #tpu.memory_space<vmem>>, vector<1x1xf32>
    %46 = vector.broadcast %45 : vector<1x1xf32> to vector<1x128xf32>
    %47 = arith.addf %43, %46 : vector<1x128xf32>
    %c0_36 = arith.constant 0 : index
    %c0_37 = arith.constant 0 : index
    %48 = vector.load %arg15[%c0_36, %c0_37] : memref<1x128xf32, #tpu.memory_space<vmem>>, vector<1x128xf32>
    tpu.vector_store %arg15[%c0_36, %c0_37], %47 {strides = array<i32>} : memref<1x128xf32, #tpu.memory_space<vmem>>, vector<1x128xf32>,
    return
  }
  func.func @transform_0(%arg0: i32) -> (i32, i32) {
    %c0_i32 = arith.constant 0 : i32
    %c0_i32_0 = arith.constant 0 : i32
    return %arg0, %c0_i32 : i32, i32
  }
  func.func @transform_1(%arg0: i32) -> (i32, i32) {
    %c0_i32 = arith.constant 0 : i32
    %c0_i32_0 = arith.constant 0 : i32
    return %c0_i32, %arg0 : i32, i32
  }
  func.func @transform_2(%arg0: i32) -> (i32, i32) {
    %c0_i32 = arith.constant 0 : i32
    %c0_i32_0 = arith.constant 0 : i32
    %c0_i32_1 = arith.constant 0 : i32
    return %c0_i32, %c0_i32_0 : i32, i32
  }
  func.func @transform_3(%arg0: i32) -> (i32, i32) {
    %c0_i32 = arith.constant 0 : i32
    %c0_i32_0 = arith.constant 0 : i32
    %c0_i32_1 = arith.constant 0 : i32
    return %c0_i32, %c0_i32_0 : i32, i32
  }
  func.func @transform_4(%arg0: i32) -> (i32, i32) {
    %c0_i32 = arith.constant 0 : i32
    %c0_i32_0 = arith.constant 0 : i32
    %c0_i32_1 = arith.constant 0 : i32
    return %c0_i32, %c0_i32_0 : i32, i32
  }
  func.func @transform_5(%arg0: i32) -> (i32, i32) {
    %c0_i32 = arith.constant 0 : i32
    %c0_i32_0 = arith.constant 0 : i32
    %c0_i32_1 = arith.constant 0 : i32
    return %c0_i32, %c0_i32_0 : i32, i32
  }
  func.func @transform_6(%arg0: i32) -> (i32, i32) {
    %c0_i32 = arith.constant 0 : i32
    %c0_i32_0 = arith.constant 0 : i32
    %c0_i32_1 = arith.constant 0 : i32
    return %c0_i32, %c0_i32_0 : i32, i32
  }
  func.func @transform_7(%arg0: i32) -> (i32, i32) {
    %c0_i32 = arith.constant 0 : i32
    %c0_i32_0 = arith.constant 0 : i32
    %c0_i32_1 = arith.constant 0 : i32
    return %c0_i32, %c0_i32_0 : i32, i32
  }
  func.func @transform_8(%arg0: i32) -> (i32, i32) {
    %c0_i32 = arith.constant 0 : i32
    %c0_i32_0 = arith.constant 0 : i32
    %c0_i32_1 = arith.constant 0 : i32
    return %c0_i32, %c0_i32_0 : i32, i32
  }
  func.func @transform_9(%arg0: i32) -> (i32, i32) {
    %c0_i32 = arith.constant 0 : i32
    %c0_i32_0 = arith.constant 0 : i32
    %c0_i32_1 = arith.constant 0 : i32
    return %c0_i32, %c0_i32_0 : i32, i32
  }
  func.func @transform_10(%arg0: i32) -> (i32, i32) {
    %c0_i32 = arith.constant 0 : i32
    %c0_i32_0 = arith.constant 0 : i32
    %c0_i32_1 = arith.constant 0 : i32
    return %c0_i32, %c0_i32_0 : i32, i32
  }
  func.func @transform_11(%arg0: i32) -> (i32, i32) {
    %c0_i32 = arith.constant 0 : i32
    %c0_i32_0 = arith.constant 0 : i32
    %c0_i32_1 = arith.constant 0 : i32
    return %c0_i32, %c0_i32_0 : i32, i32
  }
  func.func @transform_12(%arg0: i32) -> (i32, i32) {
    %c0_i32 = arith.constant 0 : i32
    %c0_i32_0 = arith.constant 0 : i32
    %c0_i32_1 = arith.constant 0 : i32
    return %c0_i32, %c0_i32_0 : i32, i32
  }
  func.func @transform_13(%arg0: i32) -> (i32, i32) {
    %c0_i32 = arith.constant 0 : i32
    %c0_i32_0 = arith.constant 0 : i32
    return %c0_i32, %arg0 : i32, i32
  }
  func.func @transform_14(%arg0: i32) -> (i32, i32) {
    %c0_i32 = arith.constant 0 : i32
    %c0_i32_0 = arith.constant 0 : i32
    return %c0_i32, %arg0 : i32, i32
  }
}

</mosaic_0001>

<bundles_post_ra>
// kernel: tpu_custom_call.1
= control target key start
LH: loop header
LB: loop body
LE: loop exit
PB: predicated region body
PF: predicated region fallthrough
CT: control target
= control target key end

     0   :  { %s1218_s0 = inlined_call_operand.vmem [shape: f32[128,16], index: 0, kind: input, shape index: {}]   ;;  %s1219_s1 = inlined_call_operand.vmem [shape: f32[8,128], index: 1, kind: input, shape index: {}]   ;;  %s1220_s2 = inlined_call_operand.vmem [shape: f32[32,16], index: 2, kind: input, shape index: {}]   ;;  %s1221_s3 = inlined_call_operand.vmem [shape: f32[32,1], index: 3, kind: input, shape index: {}]   ;;  %s1222_s4 = inlined_call_operand.vmem [shape: f32[32,32], index: 4, kind: input, shape index: {}]   ;;  %s1223_s5 = inlined_call_operand.vmem [shape: f32[32,1], index: 5, kind: input, shape index: {}]   ;;  %s1224_s6 = inlined_call_operand.vmem [shape: f32[32,32], index: 6, kind: input, shape index: {}]   ;;  %s1225_s7 = inlined_call_operand.vmem [shape: f32[32,1], index: 7, kind: input, shape index: {}]   ;;  %s1226_s8 = inlined_call_operand.vmem [shape: f32[8,32], index: 8, kind: input, shape index: {}]   ;;  %s1227_s9 = inlined_call_operand.vmem [shape: f32[8,1], index: 9, kind: input, shape index: {}]   ;;  %s1228_s10 = inlined_call_operand.vmem [shape: f32[8,1], index: 10, kind: input, shape index: {}]   ;;  %s1229_s11 = inlined_call_operand.vmem [shape: f32[8,1], index: 11, kind: input, shape index: {}]   ;;  %s1230_s12 = inlined_call_operand.<no memory space> [shape: f32[1,1], index: 12, kind: input, shape index: {}]   ;;  %s1231_s13 = inlined_call_operand.hbm [shape: f32[8,128], index: 13, kind: output, shape index: {0}]   ;;  %s1232_s14 = inlined_call_operand.hbm [shape: f32[1,128], index: 14, kind: output, shape index: {1}]  }
   0x1   :  { %v20_v0 = vstv %s1230_s12 }
   0x2   :  { %21 = vst [vmem:[#allocation2] sm:$0x1] %v20_v0 }
   0x3   :  { %22 = vsyncpa [#allocation4], 0  ;;  %v50_v1 = vld [vmem:[%s1218_s0] sm:$0xff]  ;;  %v51_v2 = vld [vmem:[%s1218_s0 + $0x8] sm:$0xff]  ;;  %vm94_vm0 = vcmask 130048   ;;  %v924_v7 = vmov 0  }
   0x4   :  { %v52_v3 = vld [vmem:[%s1218_s0 + $0x10] sm:$0xff]  ;;  %v798_v4 = vpack.c.bf16 %v51_v2, %v50_v1  ;;  %vm1019_vm1 = vmpackc.low %vm94_vm0, %vm94_vm0  ;;  %v53_v6 = vld [vmem:[%s1218_s0 + $0x18] sm:$0xff]  ;;  %874 = vset.pattern.permute.xlu0 %v924_v7  ;;  %875 = vset.pattern.permute.xlu1 %v924_v7 }
   0x5   :  { %v804_v8 = vpack.c.bf16 %v53_v6, %v52_v3  ;;  %v66_v9 = vld [vmem:[%s1220_s2] sm:$0xff]  ;;  %v55_v11 = vld [vmem:[%s1218_s0 + $0x28] sm:$0xff]  ;;  %v72_v13 = vld [vmem:[%s1221_s3 + $0x10] sm:$0xff] }
   0x6   :  { %800 = vmatprep.subr.msk.bf16.mxu0 %vm1019_vm1, %v798_v4  ;;  %v54_v10 = vld [vmem:[%s1218_s0 + $0x20] sm:$0xff]  ;;  %753 = vmatprep.mubr.msk.f32.mxu0 %vm94_vm0, %v66_v9  ;;  %v71_v15 = vld [vmem:[%s1221_s3 + $0x8] sm:$0xff]  ;;  %v73_v16 = vld [vmem:[%s1221_s3 + $0x18] sm:$0xff] }
   0x7   :  { %803 = vmatpush3.bf16.xpose.msk.msra.mxu0 %vm1019_vm1, %v798_v4  ;;  %v70_v12 = vld [vmem:[%s1221_s3] sm:$0xff]  ;;  %86 = vperm.xlu1 %875, %v72_v13   ;;  %v810_v14 = vpack.c.bf16 %v55_v11, %v54_v10 }
   0x8   :  { %806 = vmatprep.subr.msk.bf16.mxu0 %vm1019_vm1, %v804_v8  ;;  %76 = vperm.xlu0 %874, %v70_v12  }
   0xc   :  { %81 = vperm.xlu0 %874, %v71_v15  }
   0xf   :  { %809 = vmatpush3.bf16.xpose.msk.msra.mxu0 %vm1019_vm1, %v804_v8 }
  0x10   :  { %23 = vsyncpa [#allocation6], 0  ;;  %812 = vmatprep.subr.msk.bf16.mxu0 %vm1019_vm1, %v810_v14  ;;  %91 = vperm.xlu1 %875, %v73_v16   ;;  %v248_v17 = vld [vmem:[%s1223_s5] sm:$0xff]  ;;  %v56_v18 = vld [vmem:[%s1218_s0 + $0x30] sm:$0xff]  ;;  %vm272_vm2 = vcmask 261120   ;;  %vm926_vm3 = vmmov 0  }
  0x11   :  { %v57_v19 = vld [vmem:[%s1218_s0 + $0x38] sm:$0xff]  ;;  %v249_v20 = vld [vmem:[%s1223_s5 + $0x8] sm:$0xff]  ;;  %254 = vperm.xlu0 %874, %v248_v17   ;;  %v250_v22 = vld [vmem:[%s1223_s5 + $0x10] sm:$0xff] }
  0x12   :  { %v816_v21 = vpack.c.bf16 %v57_v19, %v56_v18  ;;  %v251_v23 = vld [vmem:[%s1223_s5 + $0x18] sm:$0xff]  ;;  %v378_v24 = vld [vmem:[%s1225_s7] sm:$0xff]  ;;  %v59_v26 = vld [vmem:[%s1218_s0 + $0x48] sm:$0xff]  ;;  %s928_s5 = smov [#allocation3]  }
  0x13   :  { %v58_v25 = vld [vmem:[%s1218_s0 + $0x40] sm:$0xff]  ;;  %v379_v27 = vld [vmem:[%s1225_s7 + $0x8] sm:$0xff]  ;;  %v380_v29 = vld [vmem:[%s1225_s7 + $0x10] sm:$0xff]  ;;  %s628_s20 = sshll.u32 %s928_s5, 4  ;;  %s629_s20 = int_to_ptr.vmem [resolvable:$true] %s628_s20 }
  0x14   :  { %259 = vperm.xlu1 %875, %v249_v20   ;;  %v822_v28 = vpack.c.bf16 %v59_v26, %v58_v25  ;;  %v381_v30 = vld [vmem:[%s1225_s7 + $0x18] sm:$0xff]  ;;  %v504_v31 = vld [vmem:[%s1227_s9] sm:$0xff]  ;;  %v60_v32 = vld [vmem:[%s1218_s0 + $0x50] sm:$0xff]  ;;  %p881_p1 = scmp.lt.s32.totalorder %s629_s20, %s629_s20 }
  0x15   :  { %264 = vperm.xlu0 %874, %v250_v22   ;;  %v61_v33 = vld [vmem:[%s1218_s0 + $0x58] sm:$0xff]  ;;  %v583_v34 = vld [vmem:[%s1228_s10] sm:$0xff]  ;;  %v63_v39 = vld [vmem:[%s1218_s0 + $0x68] sm:$0xff] }
  0x16   :  { %v828_v35 = vpack.c.bf16 %v61_v33, %v60_v32  ;;  %v596_v36 = vld [vmem:[%s1229_s11] sm:$0xff]  ;;  %v64_v41 = vld [vmem:[%s1218_s0 + $0x70] sm:$0xff]  ;;  %v65_v42 = vld [vmem:[%s1218_s0 + $0x78] sm:$0xff] }
  0x17   :  { %815 = vmatpush3.bf16.xpose.msk.msra.mxu0 %vm1019_vm1, %v810_v14  ;;  %v610_v37 = vld [vmem:[#allocation2] sm:$0x1]  ;;  %v840_v43 = vpack.c.bf16 %v65_v42, %v64_v41  ;;  %v67_v44 = vld [vmem:[%s1220_s2 + $0x8] sm:$0xff]  ;;  %v68_v45 = vld [vmem:[%s1220_s2 + $0x10] sm:$0xff] }
  0x18   :  { %818 = vmatprep.subr.msk.bf16.mxu0 %vm1019_vm1, %v816_v21  ;;  %269 = vperm.xlu1 %875, %v251_v23   ;;  %v62_v38 = vld [vmem:[%s1218_s0 + $0x60] sm:$0xff]  ;;  %v69_v46 = vld [vmem:[%s1220_s2 + $0x18] sm:$0xff]  ;;  %v245_v2 = vld [vmem:[%s1222_s4 + $0x8] sm:$0xff] }
  0x19   :  { %384 = vperm.xlu0 %874, %v378_v24   ;;  %v834_v40 = vpack.c.bf16 %v63_v39, %v62_v38  ;;  %v244_v47 = vld [vmem:[%s1222_s4] sm:$0xff]  ;;  %v246_v3 = vld [vmem:[%s1222_s4 + $0x10] sm:$0xff]  ;;  %v247_v4 = vld [vmem:[%s1222_s4 + $0x18] sm:$0xff] }
  0x1a   :  { %767 = vmatprep.mubr.msk.f32.mxu1 %vm272_vm2, %v244_v47  ;;  %v374_v5 = vld [vmem:[%s1224_s6] sm:$0xff]  ;;  %v375_v24 = vld [vmem:[%s1224_s6 + $0x8] sm:$0xff]  ;;  %v376_v25 = vld [vmem:[%s1224_s6 + $0x10] sm:$0xff] }
  0x1b   :  { %v377_v26 = vld [vmem:[%s1224_s6 + $0x18] sm:$0xff]  ;;  %v503_v47 = vld [vmem:[%s1226_s8] sm:$0xff]  ;;  %s876_s8 = scalar_lea.vmem %s629_s20, 128 }
  0x1c   :  { %389 = vperm.xlu1 %875, %v379_v27   ;;  %v925_v27 = vmov 0.0|0.0   ;;  %p877_p0 = scmp.ne.s32.totalorder %s629_s20, %s876_s8  ;;  %p882_p2 = scmp.lt.s32.totalorder %s876_s8, %s876_s8 }
  0x1d   :  { %394 = vperm.xlu0 %874, %v380_v29  }
  0x1e   :  { %p883_p3 = por %p882_p2, %p881_p1 }
  0x1f   :  { %821 = vmatpush3.bf16.xpose.msk.msra.mxu0 %vm1019_vm1, %v816_v21 }
  0x20   :  { %824 = vmatprep.subr.msk.bf16.mxu0 %vm1019_vm1, %v822_v28  ;;  %399 = vperm.xlu1 %875, %v381_v30   ;;  %p884_p4 = pnand %p883_p3, %p877_p0 }
  0x21   :  { %507 = vperm.xlu0 %874, %v504_v31  }
  0x24   :  { %587 = vperm.xlu1 %875, %v583_v34  }
  0x25   :  { %599 = vperm.xlu0 %874, %v596_v36  }
  0x27   :  { %827 = vmatpush3.bf16.xpose.msk.msra.mxu0 %vm1019_vm1, %v822_v28  ;;  %v927_v28 = vmov 0.0  }
  0x28   :  { %830 = vmatprep.subr.msk.bf16.mxu0 %vm1019_vm1, %v828_v35  ;;  %613 = vperm.xlu1 %875, %v610_v37  }
  0x2f   :  { %833 = vmatpush3.bf16.xpose.msk.msra.mxu0 %vm1019_vm1, %v828_v35 }
  0x30   :  { %836 = vmatprep.subr.msk.bf16.mxu0 %vm1019_vm1, %v834_v40 }
  0x37   :  { %839 = vmatpush3.bf16.xpose.msk.msra.mxu0 %vm1019_vm1, %v834_v40 }
  0x38   :  { %842 = vmatprep.subr.msk.bf16.mxu0 %vm1019_vm1, %v840_v43 }
  0x3f   :  { %845 = vmatpush3.bf16.xpose.msk.msra.mxu0 %vm1019_vm1, %v840_v43 }
  0x46   :  { %754 = vmatmul.mubr.msk.f32.vlgmr.msra.gmra.mrb[0].mxu0 %vm94_vm0, %v67_v44 }
  0x47   :  { %756 = vmatprep.mubr.msk.f32.mxu0 %vm94_vm0, %v68_v45 }
  0x4a   :  { %757 = vmatmul.mubr.msk.f32.gmra.mrb[2].mxu0 %vm94_vm0, %v69_v46 }
  0x86   :  { %v87_v49 = vpop.permute.xlu1 %86 }
  0x87   :  { %v77_v48 = vpop.permute.xlu0 %76 }
  0x8b   :  { %v82_v50 = vpop.permute.xlu0 %81 }
  0x8f   :  { %v92_v56 = vpop.permute.xlu1 %91 }
  0x90   :  { %v255_v7 = vpop.permute.xlu0 %254 }
  0x93   :  { %v260_v6 = vpop.permute.xlu1 %259 }
  0x94   :  { %v265_v16 = vpop.permute.xlu0 %264 }
  0x97   :  { %v270_v13 = vpop.permute.xlu1 %269 }
  0x98   :  { %v385_v30 = vpop.permute.xlu0 %384 }
  0x9b   :  { %v390_v29 = vpop.permute.xlu1 %389 }
  0x9c   :  { %v395_v39 = vpop.permute.xlu0 %394 }
  0x9f   :  { %v400_v36 = vpop.permute.xlu1 %399 }
 0x119   :  { %v755_v51 = vpop.f32.mrb[0].mxu0 }
 0x11a   :  { %v227_v52 = vadd.f32 %v755_v51, %v82_v50  ;;  %v221_v53 = vpop.f32.mrb[1].mxu0  ;;  %v588_v50 = vpop.permute.xlu1 %587 }
 0x11b   :  { %v222_v54 = vadd.f32 %v221_v53, %v77_v48  ;;  %v584_v48 = vld [vmem:[%s1219_s1] sm:$0xff] }
 0x11c   :  { %v241_v55 = vmax.f32 %v227_v52, 0.0  ;;  %v590_v52 = vmul.f32 %v588_v50, %v584_v48 }
 0x11d   :  { %v240_v57 = vmax.f32 %v222_v54, 0.0  ;;  %v758_v58 = vpop.f32.mrb[2].mxu0 }
 0x11e   :  { %v237_v59 = vadd.f32 %v758_v58, %v92_v56  ;;  %v231_v60 = vpop.f32.mrb[3].mxu0 }
 0x11f   :  { %v232_v61 = vadd.f32 %v231_v60, %v87_v49  ;;  %v846_v62 = vpack.c.bf16 %v241_v55, %v240_v57  ;;  %v508_v49 = vpop.permute.xlu0 %507 }
 0x120   :  { %v243_v63 = vmax.f32 %v237_v59, 0.0 }
 0x121   :  { %v242_v0 = vmax.f32 %v232_v61, 0.0  ;;  %847 = vmatprep.subr.bf16.mxu1 %v846_v62 }
 0x122   :  { %849 = vmatpush3.bf16.msra.mxu1 %v846_v62 }
 0x123   :  { %v850_v1 = vpack.c.bf16 %v243_v63, %v242_v0 }
 0x125   :  { %851 = vmatprep.subr.bf16.mxu1 %v850_v1 }
 0x126   :  { %853 = vmatpush3.bf16.msra.mxu1 %v850_v1 }
 0x129   :  { %768 = vmatmul.mubr.msk.f32.vlgmr.msra.gmra.mrb[0].mxu1 %vm272_vm2, %v245_v2 }
 0x12a   :  { %770 = vmatprep.mubr.msk.f32.mxu1 %vm272_vm2, %v246_v3 }
 0x12d   :  { %771 = vmatmul.mubr.msk.f32.gmra.mrb[2].mxu1 %vm272_vm2, %v247_v4 }
 0x12e   :  { %781 = vmatprep.mubr.msk.f32.mxu1 %vm272_vm2, %v374_v5 }
 0x1fc   :  { %v769_v8 = vpop.f32.mrb[0].mxu1 }
 0x1fd   :  { %v357_v9 = vadd.f32 %v769_v8, %v260_v6  ;;  %v351_v10 = vpop.f32.mrb[1].mxu1 }
 0x1fe   :  { %v352_v11 = vadd.f32 %v351_v10, %v255_v7 }
 0x1ff   :  { %v371_v12 = vmax.f32 %v357_v9, 0.0 }
 0x200   :  { %v370_v14 = vmax.f32 %v352_v11, 0.0  ;;  %v772_v15 = vpop.f32.mrb[2].mxu1 }
 0x201   :  { %v367_v17 = vadd.f32 %v772_v15, %v270_v13  ;;  %v361_v18 = vpop.f32.mrb[3].mxu1 }
 0x202   :  { %v854_v19 = vpack.c.bf16 %v371_v12, %v370_v14  ;;  %v362_v20 = vadd.f32 %v361_v18, %v265_v16 }
 0x203   :  { %v373_v21 = vmax.f32 %v367_v17, 0.0 }
 0x204   :  { %v372_v22 = vmax.f32 %v362_v20, 0.0  ;;  %855 = vmatprep.subr.bf16.mxu1 %v854_v19 }
 0x205   :  { %857 = vmatpush3.bf16.msra.mxu1 %v854_v19 }
 0x206   :  { %v858_v23 = vpack.c.bf16 %v373_v21, %v372_v22 }
 0x208   :  { %859 = vmatprep.subr.bf16.mxu1 %v858_v23 }
 0x209   :  { %861 = vmatpush3.bf16.msra.mxu1 %v858_v23 }
 0x20a   :  { %862 = vmatprep.subr.bf16.mxu1 %v925_v27 }
 0x20c   :  { %782 = vmatmul.mubr.msk.f32.vlgmr.msra.gmra.mrb[4].mxu1 %vm272_vm2, %v375_v24 }
 0x20d   :  { %784 = vmatprep.mubr.msk.f32.mxu1 %vm272_vm2, %v376_v25 }
 0x210   :  { %785 = vmatmul.mubr.msk.f32.gmra.mrb[6].mxu1 %vm272_vm2, %v377_v26 }
 0x211   :  { %795 = vmatprep.mubr.msk.f32.mxu1 %vm926_vm3, %v927_v28 }
 0x2df   :  { %v783_v31 = vpop.f32.mrb[4].mxu1 }
 0x2e0   :  { %v486_v32 = vadd.f32 %v783_v31, %v390_v29  ;;  %v480_v33 = vpop.f32.mrb[5].mxu1 }
 0x2e1   :  { %v481_v34 = vadd.f32 %v480_v33, %v385_v30 }
 0x2e2   :  { %v500_v35 = vmax.f32 %v486_v32, 0.0 }
 0x2e3   :  { %v499_v37 = vmax.f32 %v481_v34, 0.0  ;;  %v786_v38 = vpop.f32.mrb[6].mxu1 }
 0x2e4   :  { %v496_v40 = vadd.f32 %v786_v38, %v400_v36  ;;  %v490_v41 = vpop.f32.mrb[7].mxu1 }
 0x2e5   :  { %v863_v42 = vpack.c.bf16 %v500_v35, %v499_v37  ;;  %v491_v43 = vadd.f32 %v490_v41, %v395_v39 }
 0x2e6   :  { %v502_v44 = vmax.f32 %v496_v40, 0.0 }
 0x2e7   :  { %v501_v45 = vmax.f32 %v491_v43, 0.0  ;;  %864 = vmatpush3.bf16.msra.mxu1 %v863_v42 }
 0x2e8   :  { %865 = vmatprep.subr.bf16.mxu1 %v925_v27 }
 0x2e9   :  { %v866_v46 = vpack.c.bf16 %v502_v44, %v501_v45 }
 0x2eb   :  { %867 = vmatpush3.bf16.msra.mxu1 %v866_v46 }
 0x2ee   :  { %796 = vmatmul.mubr.msk.f32.vlgmr.msra.gmra.mrb[8].mxu1 %vm272_vm2, %v503_v47 }
 0x3c1   :  { %v579_v51 = vpop.f32.mrb[8].mxu1 }
 0x3c2   :  { %v580_v53 = vadd.f32 %v579_v51, %v508_v49  ;;  %v797_v54 = vpop.f32.mrb[9].mxu1 }
 0x3c4   :  { %v591_v55 = vadd.f32 %v590_v52, %v580_v53 }
 0x3c6   :  { %v679_v56 = vclamps-f32 %v591_v55, 3.0 }
 0x3c8   :  { %v594_v57 = vsub.f32 %v679_v56, %v580_v53  ;;  %609 = vst [vmem:[#allocation3] sm:$0xff] %v679_v56 }
 0x3c9   :  { %887 = shalt.err (!%p884_p4)
}
 0x3ca   :  { %s888_s21 = scalar_lea.hbm %s1231_s13, 128 }
 0x3cb   :  { %p889_p5 = scmp.ne.s32.totalorder %s1231_s13, %s888_s21  ;;  %p892_p6 = scmp.lt.u32.totalorder %s888_s21, %s1231_s13 }
 0x3cd   :  { %p894_p7 = pnand %p892_p6, %p889_p5 }
 0x3cf   :  { %897 = shalt.err (!%p894_p7)
}
 0x3d0   :  { %631 = dma.vmem_to_hbm [thread:$0]  %s629_s20, 128, %s1231_s13, [#allocation4]   ;;  %v595_v58 = vmul.f32 %v594_v57, %v594_v57  ;;  %v600_v59 = vpop.permute.xlu0 %599  ;;  %v616_v60 = vlaneseq  ;;  %v614_v4 = vpop.permute.xlu1 %613 }
 0x3d1   :  { %s929_s25 = smov [#allocation5]  }
 0x3d2   :  { %v602_v61 = vmul.f32 %v600_v59, %v595_v58  ;;  %v617_v63 = vshrl.u32 %v616_v60, 7  ;;  %s638_s26 = sshll.u32 %s929_s25, 4  ;;  %s639_s26 = int_to_ptr.vmem [resolvable:$true] %s638_s26 }
 0x3d3   :  { %s898_s13 = scalar_lea.vmem %s639_s26, 16  ;;  %s902_s27 = scalar_lea.vmem %s639_s26, 32 }
 0x3d4   :  { %v603_v62 = vrot.slane %v602_v61, 4  ;;  %v618_v2 = vsub.s32 0, %v617_v63  ;;  %p899_p8 = scmp.ne.s32.totalorder %s639_s26, %s898_s13  ;;  %p903_p9 = scmp.lt.s32.totalorder %s639_s26, %s639_s26 }
 0x3d5   :  { %p904_p10 = scmp.lt.s32.totalorder %s902_s27, %s898_s13 }
 0x3d6   :  { %v604_v0 = vadd.f32 %v603_v62, %v602_v61  ;;  %v619_v6 = vrot.slane %v614_v4, %v618_v2 }
 0x3d7   :  { %p905_p11 = por %p904_p10, %p903_p9 }
 0x3d8   :  { %v605_v1 = vrot.slane %v604_v0, 2 }
 0x3d9   :  { %p906_p12 = pnand %p905_p11, %p899_p8 }
 0x3da   :  { %v606_v3 = vadd.f32 %v605_v1, %v604_v0 }
 0x3dc   :  { %v607_v5 = vrot.slane %v606_v3, 1 }
 0x3de   :  { %v608_v7 = vadd.f32 %v607_v5, %v606_v3 }
 0x3e0   :  { %v620_v8 = vadd.f32 %v619_v6, %v608_v7 }
 0x3e2   :  { %621 = vst [vmem:[#allocation5] sm:$0x1] %v620_v8 }
 0x3e3   :  { %909 = shalt.err (!%p906_p12)
}
 0x3e4   :  { %s910_s29 = scalar_lea.hbm %s1232_s14, 16 }
 0x3e5   :  { %p911_p13 = scmp.ne.s32.totalorder %s1232_s14, %s910_s29  ;;  %p914_p0 = scmp.lt.u32.totalorder %s910_s29, %s1232_s14 }
 0x3e7   :  { %p916_p1 = pnand %p914_p0, %p911_p13 }
 0x3e9   :  { %919 = shalt.err (!%p916_p1)
}
 0x3ea   :  { %641 = dma.vmem_to_hbm [thread:$0]  %s639_s26, 16, %s1232_s14, [#allocation6]  }
 0x3eb   :  { %920 = dma.done.wait [#allocation4], 128  }
 0x3ec   :  { %921 = vsyncadd [#allocation4], 4294967168 }
 0x3ed   :  { %922 = dma.done.wait [#allocation6], 16  }
 0x3ee   :  { %923 = vsyncadd [#allocation6], 4294967280 }
 0x3ef   :  { %648 = vsyncpa [#allocation4], 1 }
 0x3f0   :  { %649 = vsyncpa [#allocation6], 1 }

</bundles_post_ra>
